<compile_context>
chip_gen: v7x
topology: tpu7x:2x2x1
jax: 0.10.0
libtpu: 0.0.40
codegen_flags: <defaults>
</compile_context>

<pallas_src>
import functools

import jax
import jax.numpy as jnp
from jax.experimental import pallas as pl
from jax.experimental.pallas import tpu as pltpu


def _round_up(x, m):
    return ((x + m - 1) // m) * m


def _min_d_splits():
    """Ask for >= 2 feature tiles only on dual-TensorCore chips (v7x)."""
    try:
        kind = jax.devices()[0].device_kind.lower()
    except Exception:
        return 1
    return 2 if "v7" in kind else 1


def _pick_edge_tile(num_edges, bytes_per_row, budget_bytes):
    """Largest edge tile (multiple of 128, <= 2048) whose double-buffered DMA
    blocks fit `budget_bytes`; None if even 128 does not fit."""
    cap = _round_up(max(num_edges, 1), 128)
    best = None
    for cand in (128, 256, 512, 1024, 2048):
        if cand > cap:
            break
        if 2 * cand * bytes_per_row <= budget_bytes:
            best = cand
    return best


def _pick_tiles(num_edges, d_pad, gb, itemsize, min_d_splits):
    """Choose (d_tile, edge_tile) fitting a conservative VMEM working-set
    budget (safe under v7x's 64 MiB per-TC VMEM)."""
    budget = 36 << 20
    m = d_pad // 128
    d_cands = [128 * k for k in range(m, 0, -1) if m % k == 0]   # descending
    for i, dt in enumerate(d_cands):
        is_smallest = i == len(d_cands) - 1
        if (d_pad // dt) < min_d_splits and not is_smallest:
            continue                              # v7x: want >= 2 parallel d tiles
        # accumulator + double-buffered output block + slack
        fixed = 2 * gb * dt * itemsize + gb * dt * 4 + (1 << 20)
        et = _pick_edge_tile(num_edges, dt * itemsize, budget - fixed)
        if et is not None:
            return dt, et
    return 128, 128


def _build_schedule(n_edge, num_graphs, num_edges, gb, nb, edge_tile, n_e_tiles):
    """Flat (graph-block, edge-tile) work-item schedule.

    Exploits the contiguity of segment ids (edges of graph g occupy rows
    [offsets[g], offsets[g+1])): each graph block only visits the edge tiles
    it overlaps.  Static length = n_e_tiles + nb; returns int32 arrays
    (g_of_w, e_of_w, flags) with flag bits: 1=first item of its block (zero
    the accumulator), 2=last item (write the output block), 4=do compute.
    """
    # TODO(synk): for extremely large E (schedule length > ~100k) the int32
    # schedule arrays approach the SMEM ceiling; chunk the schedule if needed.
    i32 = jnp.int32
    n_edge = n_edge.astype(i32)
    offsets = jnp.concatenate(
        [jnp.zeros((1,), i32), jnp.cumsum(n_edge, dtype=i32)])          # [G+1]

    blk_id = jnp.arange(nb, dtype=i32)
    blk_start = jnp.minimum(offsets[jnp.minimum(blk_id * gb, num_graphs)],
                            num_edges)
    blk_end = jnp.minimum(offsets[jnp.minimum((blk_id + 1) * gb, num_graphs)],
                          num_edges)
    # Tail edges beyond sum(n_edge) carry the last graph id (jnp.repeat
    # total_repeat_length pad semantics), so the last block must cover them.
    blk_end = blk_end.at[-1].set(num_edges)
    has_edges = blk_end > blk_start

    first_tile = jnp.clip(blk_start // edge_tile, 0, n_e_tiles - 1)
    last_tile = jnp.clip((blk_end - 1) // edge_tile, first_tile, n_e_tiles - 1)
    ntiles = jnp.where(has_edges, last_tile - first_tile + 1, 1)        # >= 1

    work_start = jnp.concatenate(
        [jnp.zeros((1,), i32), jnp.cumsum(ntiles, dtype=i32)])           # [NB+1]
    total_work = work_start[-1]

    max_work = n_e_tiles + nb                                            # static
    w = jnp.arange(max_work, dtype=i32)
    g_of_w = jnp.clip(jnp.searchsorted(work_start, w, side="right") - 1,
                      0, nb - 1).astype(i32)
    local = w - work_start[g_of_w]
    e_of_w = jnp.clip(first_tile[g_of_w] + local, 0, n_e_tiles - 1).astype(i32)

    in_range = w < total_work
    is_first = (local == 0) & in_range
    is_last = (w == (work_start[g_of_w] + ntiles[g_of_w] - 1)) & in_range
    is_valid = in_range & has_edges[g_of_w]
    flags = (is_first.astype(i32) + 2 * is_last.astype(i32)
             + 4 * is_valid.astype(i32))
    return g_of_w, e_of_w, flags


def _seg_sum_kernel(g_sched_ref, e_sched_ref, flags_ref,   # scalar prefetch (SMEM)
                    seg_ref, edges_ref,                     # inputs (VMEM)
                    out_ref,                                # output (VMEM)
                    acc_ref,                                # scratch (VMEM, f32)
                    *, graph_block, edge_tile, num_edges, n_e_tiles, needs_mask):
    w = pl.program_id(1)
    flags = flags_ref[w]
    is_first = (flags & 1) != 0
    is_last = (flags & 2) != 0
    is_valid = (flags & 4) != 0

    @pl.when(is_first)
    def _():
        acc_ref[...] = jnp.zeros_like(acc_ref)

    def accumulate(edges):
        seg = seg_ref[...]                                   # (1, TE) int32
        g_base = g_sched_ref[w] * graph_block
        graph_ids = g_base + jax.lax.broadcasted_iota(
            jnp.int32, (graph_block, 1), 0)                  # (GB, 1)
        onehot = (graph_ids == seg).astype(edges.dtype)      # (GB, TE)
        # Segment-sum == one-hot matmul on the MXU; the fused += keeps f32
        # accumulation on the MXU result path (MRB in-place add on v7x).
        acc_ref[...] += jnp.dot(onehot, edges,
                                preferred_element_type=jnp.float32)

    if needs_mask:
        # Ragged tail: edges are not padded on the host, so only the FINAL
        # edge tile may contain garbage rows; mask only there.
        is_tail = e_sched_ref[w] == n_e_tiles - 1

        @pl.when(is_valid & jnp.logical_not(is_tail))
        def _():
            accumulate(edges_ref[...])

        @pl.when(is_valid & is_tail)
        def _():
            e = edges_ref[...]
            row = jax.lax.broadcasted_iota(jnp.int32, (edge_tile, 1), 0)
            keep = (e_sched_ref[w] * edge_tile + row) < num_edges
            accumulate(jnp.where(keep, e, jnp.zeros((), e.dtype)))
    else:
        @pl.when(is_valid)
        def _():
            accumulate(edges_ref[...])

    @pl.when(is_last)
    def _():
        out_ref[...] = acc_ref[...].astype(out_ref.dtype)


def _segment_sum_pallas(edges, seg_ids, n_edge, num_graphs,
                        max_graphs_per_block=128):
    """out[g, :] = sum_{e : seg_ids[e] == g} edges[e, :] (contiguous segments)."""
    E, D = edges.shape
    out_dtype = edges.dtype
    itemsize = edges.dtype.itemsize

    if num_graphs <= 0:
        return jnp.zeros((max(num_graphs, 0), D), out_dtype)
    if E == 0 or D == 0:
        return jnp.zeros((num_graphs, D), out_dtype)

    # ---- static tiling decisions -------------------------------------------
    # Graph block (output tile height): keeps per-step MXU work GB*TE*D while
    # the kernel stays HBM-bound (GB <= 128 is below the compute/memory
    # balance point on v5e/v6e/v7x).
    nb = pl.cdiv(num_graphs, max_graphs_per_block)
    gb = _round_up(pl.cdiv(num_graphs, nb), 8)
    g_pad = gb * nb

    d_pad = _round_up(D, 128)                      # lane-dense stores
    d_tile, edge_tile = _pick_tiles(E, d_pad, gb, itemsize, _min_d_splits())
    n_d_tiles = d_pad // d_tile
    n_e_tiles = pl.cdiv(E, edge_tile)
    e_pad = n_e_tiles * edge_tile
    needs_mask = (E % edge_tile) != 0

    # ---- host-side prep (no [E, D] copy unless D needs lane padding) --------
    edges_in = jnp.pad(edges, ((0, 0), (0, d_pad - D))) if d_pad != D else edges
    # Only the tiny seg-id row is padded along E; the pad value (-1) never
    # matches any graph row, including padded rows of the last graph block.
    seg_row = jnp.full((1, e_pad), -1, jnp.int32).at[0, :E].set(
        seg_ids.astype(jnp.int32))

    g_sched, e_sched, flags = _build_schedule(
        n_edge, num_graphs, E, gb, nb, edge_tile, n_e_tiles)
    n_work = int(g_sched.shape[0])                 # static: n_e_tiles + nb

    # ---- VMEM limit: computed from the working set, with headroom ----------
    need = (2 * edge_tile * d_tile * itemsize      # double-buffered edges
            + 2 * 8 * edge_tile * 4                # seg row blocks
            + 2 * gb * d_tile * itemsize           # double-buffered out blocks
            + gb * d_tile * 4)                     # f32 accumulator
    vmem_limit = int(min(need + (16 << 20), 56 << 20))

    kernel = functools.partial(
        _seg_sum_kernel,
        graph_block=gb, edge_tile=edge_tile, num_edges=E,
        n_e_tiles=n_e_tiles, needs_mask=needs_mask)

    out = pl.pallas_call(
        kernel,
        out_shape=jax.ShapeDtypeStruct((g_pad, d_pad), out_dtype),
        grid_spec=pltpu.PrefetchScalarGridSpec(
            num_scalar_prefetch=3,
            grid=(n_d_tiles, n_work),
            in_specs=[
                # seg-id row follows the scheduled edge tile.
                pl.BlockSpec((1, edge_tile),
                             lambda d, w, gs, es, fs: (0, es[w])),
                # Edge features: scheduled edge tile x feature tile. Boundary
                # tiles repeat in consecutive work items => no re-DMA.
                # (If xprof ever shows exposed DMA here, add
                #  pipeline_mode=pl.Buffered(3).)
                pl.BlockSpec((edge_tile, d_tile),
                             lambda d, w, gs, es, fs: (es[w], d)),
            ],
            out_specs=pl.BlockSpec((gb, d_tile),
                                   lambda d, w, gs, es, fs: (gs[w], d)),
            scratch_shapes=[pltpu.VMEM((gb, d_tile), jnp.float32)],
        ),
        compiler_params=pltpu.CompilerParams(
            dimension_semantics=("parallel", "arbitrary"),
            vmem_limit_bytes=vmem_limit,
        ),
    )(g_sched, e_sched, flags, seg_row, edges_in)

    return out[:num_graphs, :D]


def edges_to_globals_aggregator(edges, n_edge_per_graph, num_graphs,
                                max_graphs_per_block=128):
    """Forward pass of EdgesToGlobalsAggregator with a segment-sum reducer.

    edges:             [E, D] edge features (graph.edges), E = sum(n_edge)
    n_edge_per_graph:  [G] int, number of edges in each graph
    num_graphs:        G (static python int)
    returns:           [G, D] per-graph aggregated globals
    """
    # TODO(synk): the PyTorch source uses torch.range(0, num_graphs) (inclusive,
    # deprecated) and graph.n_node as repeat counts; standard graph_nets
    # semantics (arange + per-graph edge counts matching len(edges)) are used.
    # TODO(synk): only the canonical segment-sum reducer is implemented here;
    # other reducers (mean/max) would need their own finalize step / kernel.
    if num_graphs <= 0:
        return jnp.zeros((0, edges.shape[1]), edges.dtype)
    n_edge_per_graph = n_edge_per_graph.astype(jnp.int32)
    graph_index = jnp.arange(num_graphs, dtype=jnp.int32)
    seg_ids = jnp.repeat(graph_index, n_edge_per_graph,
                         total_repeat_length=edges.shape[0])
    return _segment_sum_pallas(edges, seg_ids, n_edge_per_graph, num_graphs,
                               max_graphs_per_block=max_graphs_per_block)


if __name__ == "__main__":
    key = jax.random.PRNGKey(0)
    k1, k2 = jax.random.split(key)

    # Test 1: small graph batch, f32, D not a multiple of 128.
    num_graphs = 3
    n_edge = jnp.array([5, 9, 10], dtype=jnp.int32)
    E = int(n_edge.sum())
    D = 32
    edges = jax.random.normal(k1, (E, D), dtype=jnp.float32)
    out = jax.block_until_ready(
        edges_to_globals_aggregator(edges, n_edge, num_graphs))
    seg = jnp.repeat(jnp.arange(num_graphs), n_edge, total_repeat_length=E)
    ref = jax.ops.segment_sum(edges, seg, num_segments=num_graphs)
    assert out.shape == (num_graphs, D)
    assert jnp.allclose(out, ref, atol=1e-5, rtol=1e-5), "f32 mismatch vs ref"

    # Test 2: bf16 edges (bf16 MXU operands, f32 accumulation, bf16 output).
    edges_bf16 = edges.astype(jnp.bfloat16)
    out_bf16 = jax.block_until_ready(
        edges_to_globals_aggregator(edges_bf16, n_edge, num_graphs))
    ref_bf16 = jax.ops.segment_sum(edges_bf16.astype(jnp.float32), seg,
                                   num_segments=num_graphs)
    assert out_bf16.dtype == jnp.bfloat16
    assert jnp.allclose(out_bf16.astype(jnp.float32), ref_bf16,
                        atol=5e-2, rtol=5e-2), "bf16 mismatch vs ref"

    # Test 3: multi edge-tile / multi graph-block scheduling at small scale
    # (boundary tile shared by consecutive blocks, ragged tail, empty graphs,
    # D padded to 128).  max_graphs_per_block=8 keeps the shapes tiny.
    num_graphs3 = 20
    n_edge3 = jnp.array([37, 0, 61, 12, 45, 0, 88, 23, 54, 17,
                         66, 9, 41, 30, 72, 5, 58, 26, 49, 13], dtype=jnp.int32)
    E3 = int(n_edge3.sum())                        # 706 edges -> 2 edge tiles
    D3 = 40
    edges3 = jax.random.normal(k2, (E3, D3), dtype=jnp.float32)
    out3 = jax.block_until_ready(
        edges_to_globals_aggregator(edges3, n_edge3, num_graphs3,
                                    max_graphs_per_block=8))
    seg3 = jnp.repeat(jnp.arange(num_graphs3), n_edge3, total_repeat_length=E3)
    ref3 = jax.ops.segment_sum(edges3, seg3, num_segments=num_graphs3)
    assert out3.shape == (num_graphs3, D3)
    assert jnp.allclose(out3, ref3, atol=1e-4, rtol=1e-4), "schedule mismatch"

    # Test 4: trailing graph blocks with zero edges (dummy work items must
    # still zero-initialize their output blocks).
    n_edge4 = jnp.array([50, 50, 50, 50] + [0] * 16, dtype=jnp.int32)
    E4 = int(n_edge4.sum())                        # 200 edges
    edges4 = edges3[:E4]
    out4 = jax.block_until_ready(
        edges_to_globals_aggregator(edges4, n_edge4, num_graphs3,
                                    max_graphs_per_block=8))
    seg4 = jnp.repeat(jnp.arange(num_graphs3), n_edge4, total_repeat_length=E4)
    ref4 = jax.ops.segment_sum(edges4, seg4, num_segments=num_graphs3)
    assert jnp.allclose(out4, ref4, atol=1e-4, rtol=1e-4), "empty-block mismatch"

    print("KERNEL_OK")
</pallas_src>

<mosaic_0001>
module attributes {stable_mosaic.version = 11 : i64} {
  func.func @_seg_sum_kernel(%arg0: i32, %arg1: i32, %arg2: memref<2xi32, #tpu.memory_space<smem>>, %arg3: memref<2xi32, #tpu.memory_space<smem>>, %arg4: memref<2xi32, #tpu.memory_space<smem>>, %arg5: memref<1x128xi32, #tpu.memory_space<vmem>>, %arg6: memref<128x128xf32, #tpu.memory_space<vmem>>, %arg7: memref<8x128xf32, #tpu.memory_space<vmem>>, %arg8: memref<8x128xf32, #tpu.memory_space<vmem>>) attributes {dimension_semantics = [#tpu.dimension_semantics<parallel>, #tpu.dimension_semantics<arbitrary>], iteration_bounds = array<i64: 1, 2>, scalar_prefetch = 3 : i64, scratch_operands = 1 : i64, tpu.core_type = #tpu.core_type<tc>, window_params = [{transform_indices = @transform_0, window_bounds = array<i64: 1, 128>}, {transform_indices = @transform_1, window_bounds = array<i64: 128, 128>}, {transform_indices = @transform_2, window_bounds = array<i64: 8, 128>}]} {
    %0 = arith.index_cast %arg1 : i32 to index
    %1 = memref.load %arg4[%0] : memref<2xi32, #tpu.memory_space<smem>>
    %c1_i32 = arith.constant 1 : i32
    %2 = arith.andi %1, %c1_i32 : i32
    %c0_i32 = arith.constant 0 : i32
    %3 = arith.cmpi ne, %2, %c0_i32 : i32
    %c2_i32 = arith.constant 2 : i32
    %4 = arith.andi %1, %c2_i32 : i32
    %c0_i32_0 = arith.constant 0 : i32
    %5 = arith.cmpi ne, %4, %c0_i32_0 : i32
    %c4_i32 = arith.constant 4 : i32
    %6 = arith.andi %1, %c4_i32 : i32
    %c0_i32_1 = arith.constant 0 : i32
    %7 = arith.cmpi ne, %6, %c0_i32_1 : i32
    %8 = arith.extui %3 : i1 to i32
    %c0_i32_2 = arith.constant 0 : i32
    %9 = arith.cmpi ne, %8, %c0_i32_2 : i32
    scf.if %9 {
      %cst = arith.constant 0.000000e+00 : f32
      %22 = vector.broadcast %cst : f32 to vector<8x128xf32>
      %c0 = arith.constant 0 : index
      %c0_7 = arith.constant 0 : index
      %23 = vector.load %arg8[%c0, %c0_7] : memref<8x128xf32, #tpu.memory_space<vmem>>, vector<8x128xf32>
      tpu.vector_store %arg8[%c0, %c0_7], %22 {strides = array<i32>} : memref<8x128xf32, #tpu.memory_space<vmem>>, vector<8x128xf32>,
    } else {
    }
    %10 = arith.index_cast %arg1 : i32 to index
    %11 = memref.load %arg3[%10] : memref<2xi32, #tpu.memory_space<smem>>
    %c0_i32_3 = arith.constant 0 : i32
    %12 = arith.cmpi eq, %11, %c0_i32_3 : i32
    %true = arith.constant true
    %13 = arith.xori %12, %true : i1
    %14 = arith.andi %7, %13 : i1
    %15 = arith.extui %14 : i1 to i32
    %c0_i32_4 = arith.constant 0 : i32
    %16 = arith.cmpi ne, %15, %c0_i32_4 : i32
    scf.if %16 {
      %c0 = arith.constant 0 : index
      %c0_7 = arith.constant 0 : index
      %22 = vector.load %arg6[%c0, %c0_7] : memref<128x128xf32, #tpu.memory_space<vmem>>, vector<128x128xf32>
      %c0_8 = arith.constant 0 : index
      %c0_9 = arith.constant 0 : index
      %23 = vector.load %arg5[%c0_8, %c0_9] : memref<1x128xi32, #tpu.memory_space<vmem>>, vector<1x128xi32>
      %24 = arith.index_cast %arg1 : i32 to index
      %25 = memref.load %arg2[%24] : memref<2xi32, #tpu.memory_space<smem>>
      %c8_i32 = arith.constant 8 : i32
      %26 = arith.muli %25, %c8_i32 : i32
      %27 = tpu.iota {dimensions = array<i32: 0>} : vector<8x1xi32>
      %28 = vector.broadcast %26 : i32 to vector<8x1xi32>
      %29 = arith.addi %28, %27 : vector<8x1xi32>
      %30 = vector.broadcast %29 : vector<8x1xi32> to vector<8x128xi32>
      %31 = vector.broadcast %23 : vector<1x128xi32> to vector<8x128xi32>
      %32 = arith.cmpi eq, %30, %31 : vector<8x128xi32>
      %33 = arith.extui %32 : vector<8x128xi1> to vector<8x128xi32>
      %34 = arith.sitofp %33 : vector<8x128xi32> to vector<8x128xf32>
      %c0_10 = arith.constant 0 : index
      %c0_11 = arith.constant 0 : index
      %35 = vector.load %arg8[%c0_10, %c0_11] : memref<8x128xf32, #tpu.memory_space<vmem>>, vector<8x128xf32>
      %cst = arith.constant dense<0.000000e+00> : vector<8x128xf32>
      %36 = tpu.matmul %34, %22, %cst {dimension_numbers = #tpu.dot_dimension_numbers<[1], [0], [0], [1], [0, 0, 1, 1], [], []>} : vector<8x128xf32>, vector<128x128xf32>, vector<8x128xf32> -> vector<8x128xf32>
      %37 = arith.addf %35, %36 : vector<8x128xf32>
      %c0_12 = arith.constant 0 : index
      %c0_13 = arith.constant 0 : index
      %38 = vector.load %arg8[%c0_12, %c0_13] : memref<8x128xf32, #tpu.memory_space<vmem>>, vector<8x128xf32>
      tpu.vector_store %arg8[%c0_12, %c0_13], %37 {strides = array<i32>} : memref<8x128xf32, #tpu.memory_space<vmem>>, vector<8x128xf32>,
    } else {
    }
    %17 = arith.andi %7, %12 : i1
    %18 = arith.extui %17 : i1 to i32
    %c0_i32_5 = arith.constant 0 : i32
    %19 = arith.cmpi ne, %18, %c0_i32_5 : i32
    scf.if %19 {
      %c0 = arith.constant 0 : index
      %c0_7 = arith.constant 0 : index
      %22 = vector.load %arg6[%c0, %c0_7] : memref<128x128xf32, #tpu.memory_space<vmem>>, vector<128x128xf32>
      %23 = tpu.iota {dimensions = array<i32: 0>} : vector<128x1xi32>
      %24 = arith.index_cast %arg1 : i32 to index
      %25 = memref.load %arg3[%24] : memref<2xi32, #tpu.memory_space<smem>>
      %c128_i32 = arith.constant 128 : i32
      %26 = arith.muli %25, %c128_i32 : i32
      %27 = vector.broadcast %26 : i32 to vector<128x1xi32>
      %28 = arith.addi %27, %23 : vector<128x1xi32>
      %c24_i32 = arith.constant 24 : i32
      %29 = vector.broadcast %c24_i32 : i32 to vector<128x1xi32>
      %30 = arith.cmpi slt, %28, %29 : vector<128x1xi32>
      %cst = arith.constant 0.000000e+00 : f32
      %31 = vector.shape_cast %30 : vector<128x1xi1> to vector<128x1xi1>
      %32 = vector.broadcast %31 : vector<128x1xi1> to vector<128x128xi1>
      %33 = vector.broadcast %cst : f32 to vector<128x128xf32>
      %34 = arith.select %32, %22, %33 : vector<128x128xi1>, vector<128x128xf32>
      %c0_8 = arith.constant 0 : index
      %c0_9 = arith.constant 0 : index
      %35 = vector.load %arg5[%c0_8, %c0_9] : memref<1x128xi32, #tpu.memory_space<vmem>>, vector<1x128xi32>
      %36 = arith.index_cast %arg1 : i32 to index
      %37 = memref.load %arg2[%36] : memref<2xi32, #tpu.memory_space<smem>>
      %c8_i32 = arith.constant 8 : i32
      %38 = arith.muli %37, %c8_i32 : i32
      %39 = tpu.iota {dimensions = array<i32: 0>} : vector<8x1xi32>
      %40 = vector.broadcast %38 : i32 to vector<8x1xi32>
      %41 = arith.addi %40, %39 : vector<8x1xi32>
      %42 = vector.broadcast %41 : vector<8x1xi32> to vector<8x128xi32>
      %43 = vector.broadcast %35 : vector<1x128xi32> to vector<8x128xi32>
      %44 = arith.cmpi eq, %42, %43 : vector<8x128xi32>
      %45 = arith.extui %44 : vector<8x128xi1> to vector<8x128xi32>
      %46 = arith.sitofp %45 : vector<8x128xi32> to vector<8x128xf32>
      %c0_10 = arith.constant 0 : index
      %c0_11 = arith.constant 0 : index
      %47 = vector.load %arg8[%c0_10, %c0_11] : memref<8x128xf32, #tpu.memory_space<vmem>>, vector<8x128xf32>
      %cst_12 = arith.constant dense<0.000000e+00> : vector<8x128xf32>
      %48 = tpu.matmul %46, %34, %cst_12 {dimension_numbers = #tpu.dot_dimension_numbers<[1], [0], [0], [1], [0, 0, 1, 1], [], []>} : vector<8x128xf32>, vector<128x128xf32>, vector<8x128xf32> -> vector<8x128xf32>
      %49 = arith.addf %47, %48 : vector<8x128xf32>
      %c0_13 = arith.constant 0 : index
      %c0_14 = arith.constant 0 : index
      %50 = vector.load %arg8[%c0_13, %c0_14] : memref<8x128xf32, #tpu.memory_space<vmem>>, vector<8x128xf32>
      tpu.vector_store %arg8[%c0_13, %c0_14], %49 {strides = array<i32>} : memref<8x128xf32, #tpu.memory_space<vmem>>, vector<8x128xf32>,
    } else {
    }
    %20 = arith.extui %5 : i1 to i32
    %c0_i32_6 = arith.constant 0 : i32
    %21 = arith.cmpi ne, %20, %c0_i32_6 : i32
    scf.if %21 {
      %c0 = arith.constant 0 : index
      %c0_7 = arith.constant 0 : index
      %22 = vector.load %arg8[%c0, %c0_7] : memref<8x128xf32, #tpu.memory_space<vmem>>, vector<8x128xf32>
      %c0_8 = arith.constant 0 : index
      %c0_9 = arith.constant 0 : index
      %23 = vector.load %arg7[%c0_8, %c0_9] : memref<8x128xf32, #tpu.memory_space<vmem>>, vector<8x128xf32>
      tpu.vector_store %arg7[%c0_8, %c0_9], %22 {strides = array<i32>} : memref<8x128xf32, #tpu.memory_space<vmem>>, vector<8x128xf32>,
    } else {
    }
    return
  }
  func.func @transform_0(%arg0: i32, %arg1: i32, %arg2: memref<2xi32, #tpu.memory_space<smem>>, %arg3: memref<2xi32, #tpu.memory_space<smem>>, %arg4: memref<2xi32, #tpu.memory_space<smem>>) -> (i32, i32) {
    %0 = arith.index_cast %arg1 : i32 to index
    %1 = memref.load %arg3[%0] : memref<2xi32, #tpu.memory_space<smem>>
    %c0_i32 = arith.constant 0 : i32
    %c0_i32_0 = arith.constant 0 : i32
    return %c0_i32, %1 : i32, i32
  }
  func.func @transform_1(%arg0: i32, %arg1: i32, %arg2: memref<2xi32, #tpu.memory_space<smem>>, %arg3: memref<2xi32, #tpu.memory_space<smem>>, %arg4: memref<2xi32, #tpu.memory_space<smem>>) -> (i32, i32) {
    %0 = arith.index_cast %arg1 : i32 to index
    %1 = memref.load %arg3[%0] : memref<2xi32, #tpu.memory_space<smem>>
    %c0_i32 = arith.constant 0 : i32
    return %1, %arg0 : i32, i32
  }
  func.func @transform_2(%arg0: i32, %arg1: i32, %arg2: memref<2xi32, #tpu.memory_space<smem>>, %arg3: memref<2xi32, #tpu.memory_space<smem>>, %arg4: memref<2xi32, #tpu.memory_space<smem>>) -> (i32, i32) {
    %0 = arith.index_cast %arg1 : i32 to index
    %1 = memref.load %arg2[%0] : memref<2xi32, #tpu.memory_space<smem>>
    %c0_i32 = arith.constant 0 : i32
    return %1, %arg0 : i32, i32
  }
}

</mosaic_0001>

<bundles_post_ra>
// kernel: tpu_custom_call.1
= control target key start
LH: loop header
LB: loop body
LE: loop exit
PB: predicated region body
PF: predicated region fallthrough
CT: control target
= control target key end

     0   :  { %s1527_s0 = inlined_call_operand.hbm [shape: s32[2], index: 0, kind: input, shape index: {}]   ;;  %s1528_s3 = inlined_call_operand.vmem [shape: s32[1,128], index: 3, kind: input, shape index: {}]   ;;  %s1529_s4 = inlined_call_operand.hbm [shape: f32[24,128], index: 4, kind: input, shape index: {}]   ;;  %s1530_s5 = inlined_call_operand.hbm [shape: f32[8,128], index: 5, kind: output, shape index: {}]   ;;  %s1531_s1 = inlined_call_operand.vmem [shape: s32[2], index: 1, kind: input, shape index: {}]   ;;  %s1532_s2 = inlined_call_operand.vmem [shape: s32[2], index: 2, kind: input, shape index: {}]  }
   0x1   :  { %s968_s20 = scalar_lea.hbm %s1527_s0, 16 }
   0x2   :  { %p969_p0 = scmp.ne.s32.totalorder %s1527_s0, %s968_s20  ;;  %p972_p1 = scmp.lt.u32.totalorder %s968_s20, %s1527_s0 }
   0x4   :  { %p974_p2 = pnand %p972_p1, %p969_p0 }
   0x6   :  { %977 = shalt.err (!%p974_p2)  }
   0x7   :  { %s1140_s25 = smov [#allocation4]   ;;  %s12_s30 = sshll.u32 %s1531_s1, 4  ;;  %s13_s30 = int_to_ptr.vmem [resolvable:$true] %s12_s30 }
   0x8   :  { %11 = dma.hbm_to_smem %s1527_s0, 16, %s1140_s25, [#allocation3] }
   0x9   :  { %s16_s8 = sshll.u32 %s1532_s2, 4  ;;  %s978_s9 = scalar_lea.vmem %s13_s30, 16  ;;  %s17_s8 = int_to_ptr.vmem [resolvable:$true] %s16_s8 }
   0xa   :  { %p979_p3 = scmp.ne.s32.totalorder %s13_s30, %s978_s9  ;;  %p983_p4 = scmp.lt.s32.totalorder %s13_s30, %s13_s30 }
   0xb   :  { %p984_p5 = scmp.lt.s32.totalorder %s978_s9, %s978_s9 }
   0xd   :  { %p985_p6 = por %p984_p5, %p983_p4 }
   0xf   :  { %p986_p7 = pnand %p985_p6, %p979_p3 }
  0x11   :  { %989 = shalt.err (!%p986_p7)  }
  0x12   :  { %s1141_s10 = smov [#allocation5]   ;;  %s990_s0 = scalar_lea.vmem %s17_s8, 16 }
  0x13   :  { %15 = dma.vmem_to_smem %s13_s30, 16, %s1141_s10, [#allocation3] }
  0x14   :  { %p991_p8 = scmp.ne.s32.totalorder %s17_s8, %s990_s0  ;;  %p995_p9 = scmp.lt.s32.totalorder %s17_s8, %s17_s8 }
  0x15   :  { %p996_p10 = scmp.lt.s32.totalorder %s990_s0, %s990_s0 }
  0x17   :  { %p997_p11 = por %p996_p10, %p995_p9 }
  0x19   :  { %p998_p12 = pnand %p997_p11, %p991_p8 }
  0x1b   :  { %1001 = shalt.err (!%p998_p12)  }
  0x1c   :  { %s1142_s1 = smov [#allocation6]  }
  0x1d   :  { %19 = dma.vmem_to_smem %s17_s8, 16, %s1142_s1, [#allocation3] }
  0x1e   :  { %1094 = dma.done.wait [#allocation3], 48 }
  0x1f   :  { %1095 = vsyncadd [#allocation3], 4294967248 }
  0x20   :  { %21 = sfence }
  0x21   :  { %22 = vsyncpa [#allocation8], 0 }
  0x22   :  { %24 = vsyncpa [#allocation8 + $0x1], 0 }
  0x23   :  { %25 = vsyncpa [#allocation9], 0 }
  0x24   :  { %27 = vsyncpa [#allocation9 + $0x1], 0  ;;  %s1204_s2 = smov 0   ;;  %s1206_s11 = smov 0  }
  0x25   :  { %s1208_s12 = smov 0   ;;  %s1210_s13 = smov 0  }
  0x26   :  { %s1212_s14 = smov 0   ;;  %s1214_s15 = smov 0  }
  0x27   :  { %s1216_s16 = smov 0   ;;  %s1218_s17 = smov 0  }
  0x28   :  { %s1220_s18 = smov 0  }
  0x29 LB: > { %s666_s19 = sadd.s32 4294967295, %s1138_s18   ;;  %s667_s20 = sadd.s32 4294967294, %s1138_s18   ;;  %s1138_s18 = sphi %s1220_s18, %s33_s18   ;;  %s1134_s17 = sphi %s1218_s17, %s1548_s17   ;;  %s1130_s16 = sphi %s1216_s16, %s1547_s16   ;;  %s1126_s15 = sphi %s1214_s15, %s1546_s15   ;;  %s1122_s14 = sphi %s1212_s14, %s1545_s14   ;;  %s1118_s13 = sphi %s1210_s13, %s1544_s13   ;;  %s1114_s12 = sphi %s1208_s12, %s1543_s12   ;;  %s1110_s11 = sphi %s1206_s11, %s1542_s11   ;;  %s1106_s2 = sphi %s1204_s2, %s1541_s2  }
  0x2a   : > { %s42_s21 = sadd.s32 1, %s1134_s17  ;;  %s77_s22 = sld [smem:[#allocation5 + %s1134_s17]] }
  0x2b   : > { %p43_p13 = scmp.ge.s32.totalorder %s42_s21, 2  ;;  %p91_p0 = scmp.ne.s32.totalorder %s1126_s15, %s1122_s14 }
  0x2c   : > { %p92_p1 = scmp.eq.s32.totalorder %s1138_s18, 0  ;;  %p97_p3 = scmp.ne.s32.totalorder %s1122_s14, %s1118_s13 }
  0x2d   : > { %s1550_s21 = smov (%p43_p13, %s42_s21), 0  ;;  %p98_p4 = scmp.eq.s32.totalorder %s666_s19, 0 }
  0x2e   : > { %p1256_p2 = por %p92_p1, %p91_p0  ;;  %s78_s24 = sld [smem:[#allocation5 + %s1550_s21]] }
  0x2f   : > { %s107_s25 = sld [smem:[#allocation4 + %s1134_s17]]  ;;  %s84_s27 = sadd.s32 1, %s1126_s15 }
  0x30   : > { %s108_s26 = sld [smem:[#allocation4 + %s1550_s21]]  ;;  %p1265_p5 = por %p98_p4, %p97_p3 }
  0x31   : > { %p124_p6 = scmp.ne.s32.totalorder %s1114_s12, %s1110_s11  ;;  %p125_p7 = scmp.eq.s32.totalorder %s666_s19, 1 }
  0x32   : > { %p130_p8 = scmp.ne.s32.totalorder %s1110_s11, %s1106_s2  ;;  %p131_p9 = scmp.eq.s32.totalorder %s667_s20, 1 }
  0x33   : > { %s114_s29 = sadd.s32 1, %s1114_s12  ;;  %p1274_p10 = por %p125_p7, %p124_p6 }
  0x34   : > { %s79_s6 = ssub.s32 %s77_s22, %s78_s24  ;;  %p1278_p11 = por %p131_p9, %p130_p8 }
  0x35   : > { %p82_p12 = scmp.eq.s32.totalorder %s79_s6, 0  ;;  %p1533_p0 = scmp.ge.s32.totalorder %s1138_s18, 2 }
  0x36   : > { %s1537_s7 = scalar_select %p1278_p11, 1, 0 }
  0x37   : > { %s109_s8 = ssub.s32 %s107_s25, %s108_s26  ;;  %147 = sbr.rel (%p1533_p0) target bundleno = 98 (0x62), region = 16 }
  0x38   : > { %p112_p13 = scmp.eq.s32.totalorder %s109_s8, 0 }
  0x39   : > { %s1283_s9 = scalar_select %p82_p12, %s1126_s15, %s84_s27  }
  0x3a   : > { %s1286_s10 = scalar_select %p112_p13, %s1114_s12, %s114_s29  }
  0x3e   : > { %158 = sbr.rel (!%p1256_p2) target bundleno = 98 (0x62), region = 24  ;;  %s159_s0 = sand.u32 (%p1256_p2), 1, %s1126_s15  }
  0x3f   : > { %s164_s1 = sld [smem:[#allocation5 + %s1134_s17]] (%p1256_p2)  ;;  %s670_s13 = sshll.u32 (%p1256_p2), %s159_s0, 7 }
  0x40   : > { %s1298_s25 = scalar_lea.sflag (%p1256_p2), [#allocation8], %s159_s0  ;;  %s163_s26 = scalar_lea.vmem (%p1256_p2), [#allocation7], %s670_s13 }
  0x45   : > { %s671_s19 = sshll.u32 %s164_s1, 4 }
  0x46   : > { %s166_s20 = ssub.s32 3, %s671_s19 }
  0x47   : > { %s1295_s22 = sshll.u32 %s166_s20, 7 }
  0x48   : > { %s169_s24 = ssub.s32 2048, %s1295_s22 }
  0x49   : > { %170 = vsyncadd %s1298_s25, %s169_s24  ;;  %p673_p1 = scmp.ne.s32.totalorder %s1295_s22, 0  ;;  %s711_s23 = sshll.u32 %s164_s1, 11 }
  0x4a   : > { %s1305_s6 = scalar_lea.hbm %s1529_s4, %s711_s23  ;;  %s176_s8 = sshll.u32 %s163_s26, 4  ;;  %s1307_s8 = int_to_ptr.vmem [resolvable:$true] %s176_s8 }
  0x4b   : > { %s1002_s0 = scalar_lea.hbm %s1305_s6, %s1295_s22  ;;  %s1006_s1 = scalar_lea.hbm %s1529_s4, 384 }
  0x4c   : > { %p1003_p2 = scmp.ne.s32.totalorder %s1305_s6, %s1002_s0  ;;  %p1007_p6 = scmp.lt.u32.totalorder %s1305_s6, %s1529_s4 }
  0x4d   : > { %p1008_p7 = scmp.lt.u32.totalorder %s1006_s1, %s1002_s0  ;;  %p1010_p9 = scmp.lt.u32.totalorder %s1002_s0, %s1305_s6 }
  0x4e   : > { %p1004_p3 = pnand %p1003_p2, %p673_p1 }
  0x4f   : > { %p1009_p8 = por %p1008_p7, %p1007_p6 }
  0x50   : > { %p1005_p4 = pneg %p1004_p3 }
  0x51   : > { %p1011_p12 = por %p1010_p9, %p1009_p8 }
  0x53   : > { %p1012_p13 = pnand %p1011_p12, %p1005_p4 }
  0x55   : > { %1015 = shalt.err (!%p1012_p13)
}
  0x56   : > { %s1016_s26 = scalar_lea.vmem %s1307_s8, %s1295_s22  ;;  %s1143_s23 = smov [#allocation7]  }
  0x57   : > { %p1017_p2 = scmp.ne.s32.totalorder %s1307_s8, %s1016_s26  ;;  %s1020_s27 = sshll.u32 %s1143_s23, 4  ;;  %s1021_s27 = int_to_ptr.vmem [resolvable:$false] %s1020_s27 }
  0x58   : > { %s1022_s29 = scalar_lea.vmem %s1021_s27, 4096  ;;  %p1023_p11 = scmp.lt.s32.totalorder %s1307_s8, %s1021_s27 }
  0x59   : > { %p1018_p3 = pnand %p1017_p2, %p673_p1  ;;  %p1024_p6 = scmp.lt.s32.totalorder %s1022_s29, %s1016_s26 }
  0x5b   : > { %p1019_p0 = pneg %p1018_p3  ;;  %p1025_p7 = por %p1024_p6, %p1023_p11 }
  0x5d   : > { %p1026_p8 = pnand %p1025_p7, %p1019_p0 }
  0x5f   : > { %1029 = shalt.err (!%p1026_p8)
}
  0x60   : > { %s1144_s0 = smov 128   ;;  %s1145_s13 = smov 8  }
  0x61   : > { %182 = dma.hbm_to_vmem [thread:$0]  (%p673_p1), %s1305_s6, %s1295_s22, %s1307_s8, %s1298_s25, %s1144_s0, %s1144_s0, %s1145_s13  }
  0x62 PF: > { %p677_p4 = scmp.ge.s32.totalorder %s1138_s18, 1  ;;  %p184_p9 = scmp.lt.s32.totalorder %s1138_s18, 3 }
  0x64   : > { %p185_p12 = pnand %p677_p4, %p184_p9 }
  0x65   : > { %s190_s19 = sand.u32 (!%p185_p12), 1, %s1122_s14  }
  0x66   : > { %188 = sbr.rel (%p185_p12) target bundleno = 681 (0x2a9), region = 28  ;;  %s678_s1 = sshll.u32 (!%p185_p12), %s190_s19, 7 }
  0x67   : > { %s191_s20 = scalar_lea.sflag (!%p185_p12), [#allocation8], %s190_s19  ;;  %s1337_s24 = scalar_lea.vmem (!%p185_p12), [#allocation7], %s678_s1 }
  0x6d   : > { %1097 = dma.done.wait (%p1265_p5), %s191_s20, 2048  }
  0x6e   : > { %1099 = vsyncadd (%p1265_p5), %s191_s20, 4294965248  ;;  %s216_s22 = sand.u32 1, %s1110_s11   ;;  %s219_s25 = sld [smem:[#allocation5 + %s1130_s16]] }
  0x6f   : > { %s1346_s6 = sld [smem:[#allocation6 + %s1130_s16]]  ;;  %s1350_s8 = sshll.u32 %s216_s22, 3 }
  0x70   : > { %s218_s19 = scalar_lea.vmem [#allocation10], %s1350_s8 }
  0x74   : > { %p220_p11 = scmp.lt.s32.totalorder %s219_s25, 0 }
  0x75   : > { %s230_s26 = sand.u32 1, %s1346_s6  ;;  %s232_s23 = sand.u32 2, %s1346_s6 }
  0x76   : > { %s234_s28 = sand.u32 4, %s1346_s6  ;;  %s1552_s25 = smov (!%p220_p11, %s219_s25), 0 }
  0x77   : > { %p1355_p5 = scmp.ne.s32.totalorder %s234_s28, 0  ;;  %s1362_s13 = scalar_lea.vmem %s1528_s3, %s1552_s25 }
  0x78   : > { %p680_p0 = scmp.eq.s32.totalorder %s230_s26, 0 }
  0x79   : > { %v1146_v0 = vmov (!%p680_p0), 0.0  }
  0x7a   : > { %238 = sbr.rel (%p680_p0) target bundleno = 129 (0x81), region = 36  ;;  %239 = vst [vmem:[#allocation2] sm:$0xff] (!%p680_p0), %v1146_v0 }
  0x81 PF: > { %s1366_s1 = sld [smem:[#allocation5 + %s1130_s16]] }
  0x87   : > { %p241_p1 = scmp.eq.s32.totalorder %s1366_s1, 0  ;;  %p242_p13 = scmp.ne.s32.totalorder %s1366_s1, 0 }
  0x89   : > { %p243_p2 = pnand %p242_p13, %p1355_p5 }
  0x8a   : > { %v247_v1 = vld [vmem:[%s1337_s24] sm:$0xff] (!%p243_p2)  ;;  %v248_v2 = vld [vmem:[%s1337_s24 + $0x8] sm:$0xff] (!%p243_p2)  ;;  %v249_v3 = vld [vmem:[%s1337_s24 + $0x10] sm:$0xff] (!%p243_p2)  ;;  %v1147_v4 = vmov (!%p243_p2), 0.0|0.0   ;;  %vm1148_vm0 = vmmov (!%p243_p2), 0   ;;  %v1149_v7 = vmov (!%p243_p2), 0.0   ;;  %v266_v21 = vlaneseq (!%p243_p2) }
  0x8b   : > { %246 = sbr.rel (%p243_p2) target bundleno = 387 (0x183), region = 40  ;;  %816 = vmatprep.subr.bf16.mxu0 (!%p243_p2), %v1147_v4  ;;  %v817_v5 = vpack.c.bf16 (!%p243_p2), %v248_v2, %v247_v1  ;;  %v250_v6 = vld [vmem:[%s1337_s24 + $0x18] sm:$0xff] (!%p243_p2)  ;;  %778 = vmatprep.mubr.msk.f32.mxu0 (!%p243_p2), %vm1148_vm0, %v1149_v7  ;;  %v251_v9 = vld [vmem:[%s1337_s24 + $0x20] sm:$0xff] (!%p243_p2)  ;;  %v252_v10 = vld [vmem:[%s1337_s24 + $0x28] sm:$0xff] (!%p243_p2)  ;;  %s264_s20 = sld [smem:[#allocation4 + %s1130_s16]] (!%p243_p2)  ;;  %v1150_v32 = vmov (!%p243_p2), 1.0  }
  0x8c   : > { %v820_v8 = vpack.c.bf16 (!%p243_p2), %v250_v6, %v249_v3  ;;  %v823_v11 = vpack.c.bf16 (!%p243_p2), %v252_v10, %v251_v9  ;;  %v253_v12 = vld [vmem:[%s1337_s24 + $0x30] sm:$0xff] (!%p243_p2)  ;;  %v254_v13 = vld [vmem:[%s1337_s24 + $0x38] sm:$0xff] (!%p243_p2)  ;;  %v255_v15 = vld [vmem:[%s1337_s24 + $0x40] sm:$0xff] (!%p243_p2)  ;;  %v267_v25 = vshrl.u32 (!%p243_p2), %v266_v21, 7 }
  0x8d   : > { %818 = vmatpush3.bf16.msra.mxu0 (!%p243_p2), %v817_v5  ;;  %v826_v14 = vpack.c.bf16 (!%p243_p2), %v254_v13, %v253_v12  ;;  %v256_v16 = vld [vmem:[%s1337_s24 + $0x48] sm:$0xff] (!%p243_p2)  ;;  %v257_v18 = vld [vmem:[%s1337_s24 + $0x50] sm:$0xff] (!%p243_p2)  ;;  %v258_v19 = vld [vmem:[%s1337_s24 + $0x58] sm:$0xff] (!%p243_p2) }
  0x8e   : > { %819 = vmatprep.subr.bf16.mxu0 (!%p243_p2), %v1147_v4  ;;  %v829_v17 = vpack.c.bf16 (!%p243_p2), %v256_v16, %v255_v15  ;;  %v832_v20 = vpack.c.bf16 (!%p243_p2), %v258_v19, %v257_v18  ;;  %v259_v22 = vld [vmem:[%s1337_s24 + $0x60] sm:$0xff] (!%p243_p2)  ;;  %v260_v23 = vld [vmem:[%s1337_s24 + $0x68] sm:$0xff] (!%p243_p2)  ;;  %v261_v26 = vld [vmem:[%s1337_s24 + $0x70] sm:$0xff] (!%p243_p2) }
  0x8f   : > { %v835_v24 = vpack.c.bf16 (!%p243_p2), %v260_v23, %v259_v22  ;;  %v262_v27 = vld [vmem:[%s1337_s24 + $0x78] sm:$0xff] (!%p243_p2) }
  0x90   : > { %v838_v29 = vpack.c.bf16 (!%p243_p2), %v262_v27, %v261_v26  ;;  %v682_v31 = vld [vmem:[%s1362_s13] ss:$0 sm:$0xff] (!%p243_p2) }
  0x91   : > { %821 = vmatpush3.bf16.msra.mxu0 (!%p243_p2), %v820_v8  ;;  %s681_s25 = sshll.u32 (!%p243_p2), %s264_s20, 3  ;;  %v277_v33 = vld [vmem:[#allocation2] sm:$0xff] (!%p243_p2) }
  0x92   : > { %822 = vmatprep.subr.bf16.mxu0 %v1147_v4  ;;  %v268_v28 = vstv %s681_s25 }
  0x93   : > { %v269_v30 = vadd.s32 %v268_v28, %v267_v25 }
  0x95   : > { %824 = vmatpush3.bf16.msra.mxu0 %v823_v11  ;;  %vm274_vm1 = vcmp.eq.s32.totalorder %v269_v30, %v682_v31 }
  0x96   : > { %825 = vmatprep.subr.bf16.mxu0 %v1147_v4 }
  0x99   : > { %827 = vmatpush3.bf16.msra.mxu0 %v826_v14 }
  0x9a   : > { %828 = vmatprep.subr.bf16.mxu0 %v1147_v4 }
  0x9d   : > { %830 = vmatpush3.bf16.msra.mxu0 %v829_v17 }
  0x9e   : > { %831 = vmatprep.subr.bf16.mxu0 %v1147_v4 }
  0xa1   : > { %833 = vmatpush3.bf16.msra.mxu0 %v832_v20 }
  0xa2   : > { %834 = vmatprep.subr.bf16.mxu0 %v1147_v4 }
  0xa5   : > { %836 = vmatpush3.bf16.msra.mxu0 %v835_v24 }
  0xa6   : > { %837 = vmatprep.subr.bf16.mxu0 %v1147_v4 }
  0xa9   : > { %839 = vmatpush3.bf16.msra.mxu0 %v838_v29 }
  0xac   : > { %779 = vmatmul.mubr.msk.f32.vlgmr.msra.gmra.mrb[0].mxu0 %vm274_vm1, %v1150_v32 }
 0x17f   : > { %v344_v34 = vpop.f32.mrb[0].mxu0 }
 0x180   : > { %v348_v35 = vadd.f32 %v344_v34, %v277_v33  ;;  %v780_v36 = vpop.f32.mrb[1].mxu0 }
 0x182   : > { %349 = vst [vmem:[#allocation2] sm:$0xff] %v348_v35 }
 0x183 PF: > { %p350_p3 = pnand %p241_p1, %p1355_p5 }
 0x184   : > { %v370_v37 = vlaneseq (!%p350_p3)  ;;  %s387_s26 = sld [smem:[#allocation5 + %s1130_s16]] (!%p350_p3)  ;;  %v1151_v38 = vmov (!%p350_p3), 0.0|0.0   ;;  %vm1152_vm2 = vmmov (!%p350_p3), 0   ;;  %v1153_v40 = vmov (!%p350_p3), 0.0   ;;  %v354_v41 = vld [vmem:[%s1337_s24] sm:$0xff] (!%p350_p3)  ;;  %v355_v42 = vld [vmem:[%s1337_s24 + $0x8] sm:$0xff] (!%p350_p3) }
 0x185   : > { %353 = sbr.rel (%p350_p3) target bundleno = 646 (0x286), region = 44  ;;  %840 = vmatprep.subr.bf16.mxu0 (!%p350_p3), %v1151_v38  ;;  %813 = vmatprep.mubr.msk.f32.mxu0 (!%p350_p3), %vm1152_vm2, %v1153_v40  ;;  %v841_v49 = vpack.c.bf16 (!%p350_p3), %v355_v42, %v354_v41  ;;  %v356_v54 = vld [vmem:[%s1337_s24 + $0x10] sm:$0xff] (!%p350_p3)  ;;  %v357_v55 = vld [vmem:[%s1337_s24 + $0x18] sm:$0xff] (!%p350_p3)  ;;  %v358_v61 = vld [vmem:[%s1337_s24 + $0x20] sm:$0xff] (!%p350_p3)  ;;  %s1440_s27 = sld [smem:[#allocation4 + %s1130_s16]] (!%p350_p3)  ;;  %v1154_v36 = vmov (!%p350_p3), 1.0  }
 0x186   : > { %v1396_v39 = vshrl.u32 (!%p350_p3), %v370_v37, 7  ;;  %v845_v60 = vpack.c.bf16 (!%p350_p3), %v357_v55, %v356_v54  ;;  %v359_v62 = vld [vmem:[%s1337_s24 + $0x28] sm:$0xff] (!%p350_p3)  ;;  %v360_v4 = vld [vmem:[%s1337_s24 + $0x30] sm:$0xff] (!%p350_p3)  ;;  %v361_v5 = vld [vmem:[%s1337_s24 + $0x38] sm:$0xff] (!%p350_p3) }
 0x187   : > { %v849_v3 = vpack.c.bf16 (!%p350_p3), %v359_v62, %v358_v61  ;;  %v853_v10 = vpack.c.bf16 (!%p350_p3), %v361_v5, %v360_v4  ;;  %v362_v11 = vld [vmem:[%s1337_s24 + $0x40] sm:$0xff] (!%p350_p3)  ;;  %v363_v12 = vld [vmem:[%s1337_s24 + $0x48] sm:$0xff] (!%p350_p3)  ;;  %v364_v18 = vld [vmem:[%s1337_s24 + $0x50] sm:$0xff] (!%p350_p3) }
 0x188   : > { %v372_v43 = vadd.s32 (!%p350_p3), 8, %v1396_v39  ;;  %v373_v44 = vadd.s32 (!%p350_p3), 16, %v1396_v39  ;;  %v374_v45 = vadd.s32 (!%p350_p3), 24, %v1396_v39  ;;  %v375_v46 = vadd.s32 (!%p350_p3), 32, %v1396_v39  ;;  %v365_v19 = vld [vmem:[%s1337_s24 + $0x58] sm:$0xff] (!%p350_p3)  ;;  %v366_v25 = vld [vmem:[%s1337_s24 + $0x60] sm:$0xff] (!%p350_p3) }
 0x189   : > { %v376_v47 = vadd.s32 (!%p350_p3), 40, %v1396_v39  ;;  %v377_v58 = vadd.s32 (!%p350_p3), 48, %v1396_v39  ;;  %v378_v59 = vadd.s32 (!%p350_p3), 56, %v1396_v39  ;;  %v379_v63 = vadd.s32 (!%p350_p3), 64, %v1396_v39  ;;  %v367_v26 = vld [vmem:[%s1337_s24 + $0x68] sm:$0xff] (!%p350_p3)  ;;  %v368_v30 = vld [vmem:[%s1337_s24 + $0x70] sm:$0xff] (!%p350_p3) }
 0x18a   : > { %s685_s28 = sshll.u32 (!%p350_p3), %s387_s26, 7  ;;  %v380_v0 = vadd.s32 (!%p350_p3), 72, %v1396_v39  ;;  %v381_v6 = vadd.s32 (!%p350_p3), 80, %v1396_v39  ;;  %v382_v7 = vadd.s32 (!%p350_p3), 88, %v1396_v39  ;;  %v383_v13 = vadd.s32 (!%p350_p3), 96, %v1396_v39  ;;  %v369_v31 = vld [vmem:[%s1337_s24 + $0x78] sm:$0xff] (!%p350_p3) }
 0x18b   : > { %v1405_v48 = vstv (!%p350_p3), %s685_s28  ;;  %v384_v14 = vadd.s32 (!%p350_p3), 104, %v1396_v39  ;;  %v857_v17 = vpack.c.bf16 (!%p350_p3), %v363_v12, %v362_v11  ;;  %v385_v22 = vadd.s32 (!%p350_p3), 112, %v1396_v39  ;;  %s686_s29 = sshll.u32 (!%p350_p3), %s1440_s27, 3  ;;  %v687_v35 = vld [vmem:[%s1362_s13] ss:$0 sm:$0xff] (!%p350_p3) }
 0x18c   : > { %v390_v50 = vadd.s32 %v1405_v48, %v1396_v39  ;;  %v391_v51 = vadd.s32 %v1405_v48, %v372_v43  ;;  %v392_v52 = vadd.s32 %v1405_v48, %v373_v44  ;;  %v393_v53 = vadd.s32 %v1405_v48, %v374_v45  ;;  %v482_v37 = vld [vmem:[#allocation2] sm:$0xff] }
 0x18d   : > { %v394_v56 = vadd.s32 %v1405_v48, %v375_v46  ;;  %v395_v57 = vadd.s32 %v1405_v48, %v376_v47  ;;  %v396_v1 = vadd.s32 %v1405_v48, %v377_v58  ;;  %v397_v2 = vadd.s32 %v1405_v48, %v378_v59 }
 0x18e   : > { %vm406_vm3 = vcmp.lt.s32.totalorder %v390_v50, 24  ;;  %vm407_vm4 = vcmp.lt.s32.totalorder %v391_v51, 24  ;;  %vm408_vm5 = vcmp.lt.s32.totalorder %v392_v52, 24  ;;  %vm409_vm6 = vcmp.lt.s32.totalorder %v393_v53, 24 }
 0x18f   : > { %vm842_vm7 = vmpackc.low %vm407_vm4, %vm406_vm3  ;;  %vm410_vm9 = vcmp.lt.s32.totalorder %v394_v56, 24  ;;  %vm411_vm10 = vcmp.lt.s32.totalorder %v395_v57, 24  ;;  %vm412_vm12 = vcmp.lt.s32.totalorder %v396_v1, 24  ;;  %vm413_vm13 = vcmp.lt.s32.totalorder %v397_v2, 24 }
 0x190   : > { %843 = vmatpush3.bf16.msk.msra.mxu0 %vm842_vm7, %v841_v49  ;;  %vm846_vm8 = vmpackc.low %vm409_vm6, %vm408_vm5  ;;  %v398_v8 = vadd.s32 %v1405_v48, %v379_v63  ;;  %v399_v9 = vadd.s32 %v1405_v48, %v380_v0  ;;  %v400_v15 = vadd.s32 %v1405_v48, %v381_v6  ;;  %v401_v16 = vadd.s32 %v1405_v48, %v382_v7 }
 0x191   : > { %844 = vmatprep.subr.bf16.mxu0 %v1151_v38  ;;  %vm850_vm11 = vmpackc.low %vm411_vm10, %vm410_vm9  ;;  %v402_v20 = vadd.s32 %v1405_v48, %v383_v13  ;;  %v403_v21 = vadd.s32 %v1405_v48, %v384_v14  ;;  %v386_v23 = vadd.s32 120, %v1396_v39  ;;  %v861_v24 = vpack.c.bf16 %v365_v19, %v364_v18 }
 0x192   : > { %vm854_vm14 = vmpackc.low %vm413_vm13, %vm412_vm12  ;;  %vm414_vm15 = vcmp.lt.s32.totalorder %v398_v8, 24  ;;  %vm415_vm0 = vcmp.lt.s32.totalorder %v399_v9, 24  ;;  %vm416_vm2 = vcmp.lt.s32.totalorder %v400_v15, 24  ;;  %vm417_vm3 = vcmp.lt.s32.totalorder %v401_v16, 24 }
 0x193   : > { %vm858_vm1 = vmpackc.low %vm415_vm0, %vm414_vm15  ;;  %vm418_vm5 = vcmp.lt.s32.totalorder %v402_v20, 24  ;;  %vm419_vm6 = vcmp.lt.s32.totalorder %v403_v21, 24  ;;  %v404_v27 = vadd.s32 %v1405_v48, %v385_v22  ;;  %v405_v28 = vadd.s32 %v1405_v48, %v386_v23 }
 0x194   : > { %847 = vmatpush3.bf16.msk.msra.mxu0 %vm846_vm8, %v845_v60  ;;  %vm862_vm4 = vmpackc.low %vm417_vm3, %vm416_vm2  ;;  %v865_v29 = vpack.c.bf16 %v367_v26, %v366_v25  ;;  %v473_v32 = vstv %s686_s29  ;;  %v869_v33 = vpack.c.bf16 %v369_v31, %v368_v30 }
 0x195   : > { %848 = vmatprep.subr.bf16.mxu0 %v1151_v38  ;;  %vm866_vm7 = vmpackc.low %vm419_vm6, %vm418_vm5  ;;  %vm420_vm8 = vcmp.lt.s32.totalorder %v404_v27, 24  ;;  %vm421_vm9 = vcmp.lt.s32.totalorder %v405_v28, 24  ;;  %v474_v34 = vadd.s32 %v473_v32, %v1396_v39 }
 0x196   : > { %vm870_vm10 = vmpackc.low %vm421_vm9, %vm420_vm8 }
 0x198   : > { %851 = vmatpush3.bf16.msk.msra.mxu0 %vm850_vm11, %v849_v3  ;;  %vm479_vm11 = vcmp.eq.s32.totalorder %v474_v34, %v687_v35 }
 0x199   : > { %852 = vmatprep.subr.bf16.mxu0 %v1151_v38 }
 0x19c   : > { %855 = vmatpush3.bf16.msk.msra.mxu0 %vm854_vm14, %v853_v10 }
 0x19d   : > { %856 = vmatprep.subr.bf16.mxu0 %v1151_v38 }
 0x1a0   : > { %859 = vmatpush3.bf16.msk.msra.mxu0 %vm858_vm1, %v857_v17 }
 0x1a1   : > { %860 = vmatprep.subr.bf16.mxu0 %v1151_v38 }
 0x1a4   : > { %863 = vmatpush3.bf16.msk.msra.mxu0 %vm862_vm4, %v861_v24 }
 0x1a5   : > { %864 = vmatprep.subr.bf16.mxu0 %v1151_v38 }
 0x1a8   : > { %867 = vmatpush3.bf16.msk.msra.mxu0 %vm866_vm7, %v865_v29 }
 0x1a9   : > { %868 = vmatprep.subr.bf16.mxu0 %v1151_v38 }
 0x1ac   : > { %871 = vmatpush3.bf16.msk.msra.mxu0 %vm870_vm10, %v869_v33 }
 0x1af   : > { %814 = vmatmul.mubr.msk.f32.vlgmr.msra.gmra.mrb[0].mxu0 %vm479_vm11, %v1154_v36 }
 0x282   : > { %v549_v40 = vpop.f32.mrb[0].mxu0 }
 0x283   : > { %v553_v41 = vadd.f32 %v549_v40, %v482_v37  ;;  %v815_v42 = vpop.f32.mrb[1].mxu0 }
 0x285   : > { %554 = vst [vmem:[#allocation2] sm:$0xff] %v553_v41 }
 0x286 PF: > { %p706_p6 = scmp.eq.s32.totalorder %s232_s23, 0 }
 0x288   : > { %557 = sbr.rel (%p706_p6) target bundleno = 655 (0x28f), region = 48 }
 0x28c   : > { %v558_v43 = vld [vmem:[#allocation2] sm:$0xff] (!%p706_p6) }
 0x28d   : > { %559 = vst [vmem:[%s218_s19] sm:$0xff] (!%p706_p6), %v558_v43 }
 0x28f PF: > { %s873_s24 = scalar_select %p1274_p10, [#allocation4], [#allocation11] }
 0x290   : > { %s1554_s16 = smov (!%p1274_p10, %s1130_s16), 0  ;;  %s576_s6 = sshll.u32 %s218_s19, 4  ;;  %s1472_s6 = int_to_ptr.vmem [resolvable:$true] %s576_s6 }
 0x291   : > { %s568_s0 = sld [smem:[%s873_s24 + %s1554_s16]]  ;;  %s561_s25 = scalar_lea.sflag [#allocation9], %s216_s22 }
 0x292   : > { %s1030_s26 = scalar_lea.vmem %s1472_s6, 128  ;;  %s1155_s16 = smov [#allocation10]  }
 0x293   : > { %p1031_p7 = scmp.ne.s32.totalorder %s1472_s6, %s1030_s26  ;;  %s1034_s8 = sshll.u32 %s1155_s16, 4  ;;  %s1035_s8 = int_to_ptr.vmem [resolvable:$false] %s1034_s8 }
 0x294   : > { %s1036_s19 = scalar_lea.vmem %s1035_s8, 256  ;;  %p1037_p9 = scmp.lt.s32.totalorder %s1472_s6, %s1035_s8 }
 0x295   : > { %p1032_p8 = pnand %p1031_p7, %p1274_p10  ;;  %p1038_p12 = scmp.lt.s32.totalorder %s1036_s19, %s1030_s26 }
 0x297   : > { %s708_s23 = sshll.u32 %s568_s0, 7  ;;  %p1033_p4 = pneg %p1032_p8 }
 0x298   : > { %s574_s20 = scalar_lea.hbm %s1530_s5, %s708_s23  ;;  %p1039_p11 = por %p1038_p12, %p1037_p9 }
 0x29a   : > { %p1040_p5 = pnand %p1039_p11, %p1033_p4 }
 0x29c   : > { %1043 = shalt.err (!%p1040_p5)
}
 0x29d   : > { %s1044_s28 = scalar_lea.hbm %s574_s20, 128  ;;  %s1048_s29 = scalar_lea.hbm %s1530_s5, 128 }
 0x29e   : > { %p1045_p0 = scmp.ne.s32.totalorder %s574_s20, %s1044_s28  ;;  %p1049_p2 = scmp.lt.u32.totalorder %s574_s20, %s1530_s5 }
 0x29f   : > { %p1050_p3 = scmp.lt.u32.totalorder %s1048_s29, %s1044_s28  ;;  %p1052_p7 = scmp.lt.u32.totalorder %s1044_s28, %s574_s20 }
 0x2a0   : > { %p1046_p1 = pnand %p1045_p0, %p1274_p10 }
 0x2a1   : > { %p1051_p6 = por %p1050_p3, %p1049_p2 }
 0x2a2   : > { %p1047_p13 = pneg %p1046_p1 }
 0x2a3   : > { %p1053_p8 = por %p1052_p7, %p1051_p6 }
 0x2a5   : > { %p1054_p4 = pnand %p1053_p8, %p1047_p13 }
 0x2a7   : > { %1057 = shalt.err (!%p1054_p4)
}
 0x2a8   : > { %875 = dma.vmem_to_hbm [thread:$0]  (%p1274_p10), %s1472_s6, 128, %s574_s20, %s561_s25  }
 0x2a9 PF: > { %s588_s23 = sand.u32 1, %s1106_s2   ;;  %p1539_p9 = scmp.ne.s32.totalorder %s1537_s7, 0 }
 0x2aa   : > { %p1540_p12 = scmp.ge.s32.totalorder %s1138_s18, 2  ;;  %s589_s13 = scalar_lea.sflag [#allocation9], %s588_s23 }
 0x2ac   : > { %p878_p11 = pnand %p1540_p12, %p1539_p9 }
 0x2ae   : > { %1101 = dma.done.wait (!%p878_p11), %s589_s13, 128  }
 0x2af   : > { %1103 = vsyncadd (!%p878_p11), %s589_s13, 4294967168  ;;  %s33_s18 = sadd.s32 1, %s1138_s18   ;;  %s1541_s2 = smov %s1110_s11 }
 0x2b0   : > { %p30_p5 = scmp.ge.s32.totalorder %s33_s18, 4   ;;  %s1542_s11 = smov %s1114_s12 }
 0x2b1   : > { %s1543_s12 = smov %s1286_s10  ;;  %s1544_s13 = smov %s1122_s14 }
 0x2b2   : > { %s1545_s14 = smov %s1126_s15  ;;  %s1546_s15 = smov %s1283_s9 }
 0x2b3   : > { %s1547_s16 = smov %s1134_s17  ;;  %s1548_s17 = smov %s1550_s21 }
 0x2b4   :  { %32 = sbr.rel (!%p30_p5) target bundleno = 41 (0x29), region = 92 }
 0x2bb   :  { %594 = vsyncpa [#allocation8], 1 }
 0x2bc   :  { %596 = vsyncpa [#allocation8 + $0x1], 1 }
 0x2bd   :  { %597 = vsyncpa [#allocation9], 1 }
 0x2be   :  { %599 = vsyncpa [#allocation9 + $0x1], 1 }

</bundles_post_ra>
